<compile_context>
chip_gen: v5e
topology: v5e:2x2
jax: 0.10.0
libtpu: 0.0.40
codegen_flags: <defaults>
</compile_context>

<pallas_src>
import math

import jax
import jax.numpy as jnp
from jax.experimental import pallas as pl
from jax.experimental.pallas import tpu as pltpu


def _make_pe(d_model: int, max_len: int = 5000) -> jnp.ndarray:
    """Deterministic sinusoidal table, identical to the PyTorch __init__."""
    position = jnp.arange(0, max_len, dtype=jnp.float32)[:, None]          # (L, 1)
    div_term = jnp.exp(
        jnp.arange(0, d_model, 2, dtype=jnp.float32)
        * (-math.log(10000.0) / d_model)
    )                                                                      # (D/2,)
    pe = jnp.zeros((max_len, d_model), dtype=jnp.float32)
    pe = pe.at[:, 0::2].set(jnp.sin(position * div_term))
    pe = pe.at[:, 1::2].set(jnp.cos(position * div_term))
    return pe[:, None, :]                                                  # (L, 1, D)


def _add_pe_kernel(x_ref, pe_ref, o_ref):
    # Pure broadcast-add.  Handles both layouts:
    #   aligned path : x (TS, B, D)  + pe (TS, 1, D)   (broadcast over batch)
    #   flat path    : x (TS, B*D)   + pe (TS, B*D)
    o_ref[...] = (x_ref[...] + pe_ref[...]).astype(o_ref.dtype)


def _choose_block_rows(n_rows: int, row_bytes: int,
                       vmem_budget_bytes: int = 12 * 1024 * 1024) -> int:
    """How many sequence rows per grid block.

    Budget: ~3 VMEM-resident arrays (x, pe, out) x 2 pipeline buffers, kept
    inside the *default* scoped-VMEM limit on every generation (16 MiB v5e,
    32 MiB v6e/v7x), so no vmem_limit override is needed.
    """
    fit = max(8, vmem_budget_bytes // (6 * max(row_bytes, 1)))
    ts = min(n_rows, fit)
    # v7x has 2 TensorCores: keep >=2 blocks on the parallel axis only when
    # there is enough work for the split to beat the per-step grid overhead.
    if ts == n_rows and n_rows >= 16 and n_rows * row_bytes >= (1 << 20):
        ts = -(-n_rows // 2)  # ceil(n_rows / 2)
    if ts < n_rows:
        ts = max(8, (ts // 8) * 8)  # sublane-aligned unless block == full extent
    return ts


def positional_encoding(x: jnp.ndarray, pe: jnp.ndarray) -> jnp.ndarray:
    """x: (S, B, D); pe: (max_len, 1, D) sinusoidal buffer.  Returns x + pe[:S]."""
    S, B, D = x.shape
    itemsize = jnp.dtype(x.dtype).itemsize
    compiler_params = pltpu.CompilerParams(dimension_semantics=("parallel",))

    if D % 128 == 0:
        # Last dim already lane-dense: keep (S, B, D), chunk TS rows per block,
        # pass the FULL pe buffer (no pe[:S] copy; only the first ceil(S/TS)
        # blocks are ever DMA'd) and broadcast its (TS, 1, D) block over the
        # batch axis inside the kernel.
        ts = _choose_block_rows(S, B * D * itemsize)
        grid = (pl.cdiv(S, ts),)
        cost = pl.CostEstimate(
            flops=S * B * D,
            transcendentals=0,
            bytes_accessed=(2 * S * B * D + S * D) * itemsize,
        )
        return pl.pallas_call(
            _add_pe_kernel,
            out_shape=jax.ShapeDtypeStruct((S, B, D), x.dtype),
            grid=grid,
            in_specs=[
                pl.BlockSpec((ts, B, D), lambda s: (s, 0, 0)),
                pl.BlockSpec((ts, 1, D), lambda s: (s, 0, 0)),
            ],
            out_specs=pl.BlockSpec((ts, B, D), lambda s: (s, 0, 0)),
            compiler_params=compiler_params,
            cost_estimate=cost,
        )(x, pe)

    # D not a multiple of 128 (e.g. d_model=32): flatten to a lane-dense 2-D
    # view (S, B*D) so stores are as wide as possible instead of 32-lane masked
    # partial stores, and tile pe over the batch in the wrapper (column c of
    # pe_flat == pe[:, c % D], matching the row-major (S,B,D)->(S,B*D) reshape).
    BD = B * D
    xr = x.reshape(S, BD)                        # free row-major view
    pe_flat = jnp.tile(pe[:S, 0, :], (1, B))     # (S, B*D)
    ts = _choose_block_rows(S, BD * itemsize)
    grid = (pl.cdiv(S, ts),)
    cost = pl.CostEstimate(
        flops=S * BD,
        transcendentals=0,
        bytes_accessed=3 * S * BD * itemsize,
    )
    out = pl.pallas_call(
        _add_pe_kernel,
        out_shape=jax.ShapeDtypeStruct((S, BD), x.dtype),
        grid=grid,
        in_specs=[
            pl.BlockSpec((ts, BD), lambda s: (s, 0)),
            pl.BlockSpec((ts, BD), lambda s: (s, 0)),
        ],
        out_specs=pl.BlockSpec((ts, BD), lambda s: (s, 0)),
        compiler_params=compiler_params,
        cost_estimate=cost,
    )(xr, pe_flat)
    return out.reshape(S, B, D)


if __name__ == "__main__":
    key = jax.random.PRNGKey(0)
    pe_add = jax.jit(positional_encoding)   # fuse wrapper reshapes/tile + kernel

    # Case 1: module-like small shapes (d_model=32 -> lane-dense flat path).
    seq_len, batch, d_model = 8, 2, 32
    max_len = 64  # small synthetic table (module default is 5000)
    x = jax.random.normal(key, (seq_len, batch, d_model), dtype=jnp.float32)
    pe = _make_pe(d_model, max_len=max_len)
    out = jax.block_until_ready(pe_add(x, pe))
    ref = x + pe[:seq_len]
    assert out.shape == (seq_len, batch, d_model)
    assert jnp.allclose(out, ref, atol=1e-6), "mismatch vs reference (flat path)"

    # Case 2: 128-aligned d_model exercises the 3-D in-kernel batch-broadcast path.
    seq_len2, batch2, d_model2 = 16, 2, 128
    x2 = jax.random.normal(jax.random.PRNGKey(0), (seq_len2, batch2, d_model2),
                           dtype=jnp.float32)
    pe2 = _make_pe(d_model2, max_len=max_len)
    out2 = jax.block_until_ready(pe_add(x2, pe2))
    ref2 = x2 + pe2[:seq_len2]
    assert out2.shape == (seq_len2, batch2, d_model2)
    assert jnp.allclose(out2, ref2, atol=1e-6), "mismatch vs reference (aligned path)"

    print("KERNEL_OK")
</pallas_src>

<mosaic_0001>
module attributes {stable_mosaic.version = 11 : i64} {
  func.func @_add_pe_kernel(%arg0: i32, %arg1: memref<8x64xf32, #tpu.memory_space<vmem>>, %arg2: memref<8x64xf32, #tpu.memory_space<vmem>>, %arg3: memref<8x64xf32, #tpu.memory_space<vmem>>) attributes {dimension_semantics = [#tpu.dimension_semantics<parallel>], iteration_bounds = array<i64: 1>, scalar_prefetch = 0 : i64, scratch_operands = 0 : i64, tpu.core_type = #tpu.core_type<tc>, window_params = [{transform_indices = @transform_0, window_bounds = array<i64: 8, 64>}, {transform_indices = @transform_1, window_bounds = array<i64: 8, 64>}, {transform_indices = @transform_2, window_bounds = array<i64: 8, 64>}]} {
    %c0 = arith.constant 0 : index
    %c0_0 = arith.constant 0 : index
    %0 = vector.load %arg1[%c0, %c0_0] : memref<8x64xf32, #tpu.memory_space<vmem>>, vector<8x64xf32>
    %c0_1 = arith.constant 0 : index
    %c0_2 = arith.constant 0 : index
    %1 = vector.load %arg2[%c0_1, %c0_2] : memref<8x64xf32, #tpu.memory_space<vmem>>, vector<8x64xf32>
    %2 = arith.addf %0, %1 : vector<8x64xf32>
    %c0_3 = arith.constant 0 : index
    %c0_4 = arith.constant 0 : index
    %3 = vector.load %arg3[%c0_3, %c0_4] : memref<8x64xf32, #tpu.memory_space<vmem>>, vector<8x64xf32>
    tpu.vector_store %arg3[%c0_3, %c0_4], %2 {strides = array<i32>} : memref<8x64xf32, #tpu.memory_space<vmem>>, vector<8x64xf32>,
    return
  }
  func.func @transform_0(%arg0: i32) -> (i32, i32) {
    %c0_i32 = arith.constant 0 : i32
    %c0_i32_0 = arith.constant 0 : i32
    return %arg0, %c0_i32 : i32, i32
  }
  func.func @transform_1(%arg0: i32) -> (i32, i32) {
    %c0_i32 = arith.constant 0 : i32
    %c0_i32_0 = arith.constant 0 : i32
    return %arg0, %c0_i32 : i32, i32
  }
  func.func @transform_2(%arg0: i32) -> (i32, i32) {
    %c0_i32 = arith.constant 0 : i32
    %c0_i32_0 = arith.constant 0 : i32
    return %arg0, %c0_i32 : i32, i32
  }
}

</mosaic_0001>

<bundles_post_ra>
// kernel: tile.7
= control target key start
LH: loop header
LB: loop body
LE: loop exit
PB: predicated region body
PF: predicated region fallthrough
CT: control target
= control target key end

     0   :  { %vm36_vm0 = vcmask 1047556   ;;  %vm38_vm1 = vcmask 261120   ;;  %vm48_vm2 = vcmask 523520   ;;  %s99_s0 = inlined_call_operand.vmem [shape: f32[8,2,32], index: 0, kind: input, shape index: {}]   ;;  %s100_s1 = inlined_call_operand.vmem [shape: f32[8,64], index: 1, kind: output, shape index: {}]  }
   0x1   :  { %v50_v0 = vld [vmem:[%s99_s0 + $0xe] sm:$0x3]  ;;  %v51_v1 = vld [vmem:[%s99_s0 + $0xc] sm:$0x3]  ;;  %v52_v2 = vld [vmem:[%s99_s0 + $0xa] sm:$0x3] }
   0x2   :  { %7 = vst [vmem:[#allocation0 + $0x38] sm:$0x3] %v50_v0  ;;  %v53_v3 = vld [vmem:[%s99_s0 + $0x8] sm:$0x3]  ;;  %v54_v4 = vld [vmem:[%s99_s0 + $0x6] sm:$0x3] }
   0x3   :  { %11 = vst [vmem:[#allocation0 + $0x30] sm:$0x3] %v51_v1  ;;  %v55_v5 = vld [vmem:[%s99_s0 + $0x4] sm:$0x3]  ;;  %v56_v6 = vld [vmem:[%s99_s0 + $0x2] sm:$0x3] }
   0x4   :  { %15 = vst [vmem:[#allocation0 + $0x28] sm:$0x3] %v52_v2  ;;  %v32_v7 = vld [vmem:[%s99_s0] sm:$0x3]  ;;  %s58_s0 = smov 32  }
   0x5   :  { %19 = vst [vmem:[#allocation0 + $0x20] sm:$0x3] %v53_v3 }
   0x6   :  { %23 = vst [vmem:[#allocation0 + $0x18] sm:$0x3] %v54_v4 }
   0x7   :  { %27 = vst [vmem:[#allocation0 + $0x10] sm:$0x3] %v55_v5 }
   0x8   :  { %31 = vst [vmem:[#allocation0 + $0x8] sm:$0x3] %v56_v6 }
   0x9   :  { %33 = vst [vmem:[#allocation0] sm:$0x3] %v32_v7 }
   0xc   :  { %v35_v8 = vld [vmem:[#allocation0] ss:$8 sm:$0xf0]   ;;  %v43_v9 = vld [vmem:[#allocation0 + $0x1] ss:$8 sm:$0xf0]  }
  0x10   :  { %v34_v10 = vld [vmem:[#allocation0] ss:$8 sm:$0xf]   ;;  %v41_v11 = vld [vmem:[#allocation0 + $0x1] ss:$8 sm:$0xf]  }
  0x11   :  { %v37_v12 = vsel %vm36_vm0, %v35_v8, %v34_v10  ;;  %v45_v13 = vsel %vm36_vm0, %v43_v9, %v41_v11 }
  0x12   :  { %46 = vrot.lane.b32.xlu0 %v45_v13, %s58_s0  ;;  %39 = vst.msk [vmem:[%s100_s1] sm:$0xff] %vm38_vm1, %v37_v12  }
  0x84   :  { %v47_v14 = vpop.permute.xlu0 %46  }
  0x85   :  { %49 = vst.msk [vmem:[%s100_s1] sm:$0xff] %vm48_vm2, %v47_v14  }

// kernel: positional_encoding.1
= control target key start
LH: loop header
LB: loop body
LE: loop exit
PB: predicated region body
PF: predicated region fallthrough
CT: control target
= control target key end

     0   :  { %vm14_vm0 = vcmask 523264   ;;  %s44_s0 = inlined_call_operand.vmem [shape: f32[8,64], index: 0, kind: input, shape index: {}]   ;;  %s45_s1 = inlined_call_operand.vmem [shape: f32[8,64], index: 1, kind: input, shape index: {}]   ;;  %s46_s2 = inlined_call_operand.vmem [shape: f32[8,64], index: 2, kind: output, shape index: {}]  }
   0x1   :  { %v11_v0 = vld [vmem:[%s44_s0] sm:$0xff] }
   0x2   :  { %v12_v1 = vld [vmem:[%s45_s1] sm:$0xff] }
   0x3   :  { %v13_v2 = vadd.f32 %v12_v1, %v11_v0 }
   0x5   :  { %15 = vst.msk [vmem:[%s46_s2] sm:$0xff] %vm14_vm0, %v13_v2 }

</bundles_post_ra>
